<compile_context>
chip_gen: v7x
topology: tpu7x:2x2x1
jax: 0.10.0
libtpu: 0.0.40
codegen_flags: <defaults>
</compile_context>

<pallas_src>
import functools

import jax
import jax.numpy as jnp
from jax.experimental import pallas as pl
from jax.experimental.pallas import tpu as pltpu


def _round_up(n, m):
    return ((n + m - 1) // m) * m


def _pad_gate_cols(w, hidden, hp):
    """(rows, 4*hidden) -> (rows, 4*hp): each i/f/g/o block zero-padded to hp."""
    rows = w.shape[0]
    w4 = w.reshape(rows, 4, hidden)
    w4 = jnp.pad(w4, ((0, 0), (0, 0), (0, hp - hidden)))
    return w4.reshape(rows, 4 * hp)


def _make_kernel(seq, t_chunk, bt, hp, nt):
    """Builds the chunked LSTM + fused Linear kernel (static shapes closed over)."""
    needs_mask = (seq % t_chunk) != 0
    unroll = 4 if t_chunk % 4 == 0 else (2 if t_chunk % 2 == 0 else 1)

    def kernel(x_ref, w_ih_ref, w_hh_ref, b_ref, w_out_ref, b_out_ref,
               y_ref, xp_ref, h_ref, c_ref):
        # x_ref   : (t_chunk, bt, in8)   current time-chunk / batch-tile of x
        # w_ih_ref: (in8, 4*hp)          input->gates weights (resident)
        # w_hh_ref: (hp, 4*hp)           hidden->gates weights (resident)
        # b_ref   : (1, 4*hp)            b_ih + b_hh (f32)
        # w_out_ref:(hp, op)             linear_1 weight
        # b_out_ref:(1, op)              linear_1 bias (f32)
        # y_ref   : (bt, op)             output tile (written at last chunk)
        # xp_ref  : (t_chunk*bt, 4*hp)   per-chunk hoisted input projection (f32)
        # h_ref/c_ref: (bt, hp)          LSTM state, persists across time chunks
        t_idx = pl.program_id(1)
        in8 = x_ref.shape[-1]
        cdt = w_hh_ref.dtype

        @pl.when(t_idx == 0)
        def _():
            h_ref[...] = jnp.zeros_like(h_ref)
            c_ref[...] = jnp.zeros_like(c_ref)

        # (1) Hoisted input projection for this chunk: ONE MXU matmul over all
        #     timesteps of the chunk, stored to VMEM scratch (f32).
        x2d = x_ref[...].reshape(t_chunk * bt, in8)
        xp_ref[...] = (jnp.dot(x2d, w_ih_ref[...],
                               preferred_element_type=jnp.float32)
                       + b_ref[...])

        # (2) Serial recurrence over the chunk.  fori_loop (not full unroll)
        #     keeps vreg live ranges bounded; small unroll gives LLO room to
        #     overlap the per-step matmul with gate elementwise work.
        def step(i, carry):
            h, c = carry
            row = pl.multiple_of(i * bt, 8)
            x_t = xp_ref[pl.ds(row, bt), :]                       # (bt, 4*hp)
            gates = x_t + jnp.dot(h.astype(cdt), w_hh_ref[...],
                                  preferred_element_type=jnp.float32)
            # sigmoid(z) = 0.5*(1 + tanh(z/2)) -> halves EUP transcendentals.
            ig = 0.5 * (1.0 + jnp.tanh(0.5 * gates[:, 0 * hp:1 * hp]))
            fg = 0.5 * (1.0 + jnp.tanh(0.5 * gates[:, 1 * hp:2 * hp]))
            gg = jnp.tanh(gates[:, 2 * hp:3 * hp])
            og = 0.5 * (1.0 + jnp.tanh(0.5 * gates[:, 3 * hp:4 * hp]))
            c_new = fg * c + ig * gg
            h_new = og * jnp.tanh(c_new)
            if needs_mask:
                valid = (t_idx * t_chunk + i) < seq               # padded steps
                h_new = jnp.where(valid, h_new, h)
                c_new = jnp.where(valid, c_new, c)
            return (h_new, c_new)

        h, c = jax.lax.fori_loop(0, t_chunk, step, (h_ref[...], c_ref[...]),
                                 unroll=unroll)
        h_ref[...] = h
        c_ref[...] = c

        # (3) dropout(p=0.2) is identity in eval; fused output linear, written
        #     only once per batch tile (lane-dense store, op % 128 == 0).
        @pl.when(t_idx == nt - 1)
        def _():
            y_ref[...] = (jnp.dot(h.astype(cdt), w_out_ref[...],
                                  preferred_element_type=jnp.float32)
                          + b_out_ref[...])

    return kernel


def text_subnet_forward(x, params, t_chunk=None, batch_tile=None,
                        compute_dtype=jnp.bfloat16):
    """x: (batch, seq, in_size) f32 -> (batch, out_size) f32 (eval mode)."""
    batch, seq, in_size = x.shape
    hidden = params["w_hh_T"].shape[0]
    out_size = params["w_out_T"].shape[1]

    bp = _round_up(batch, 8)          # sublane multiple
    hp = _round_up(hidden, 128)       # lane multiple -> aligned gate slices
    op = _round_up(out_size, 128)     # lane-dense (unmasked) output store
    in8 = _round_up(in_size, 8)       # only sublane-pad K (no 128 blowup)

    # batch tiling (parallel axis; shards the recurrence across v7x's 2 TCs
    # when there are >= 2 tiles; a single tile otherwise).
    if batch_tile is None:
        bt = min(bp, 128)
    else:
        bt = min(_round_up(batch_tile, 8), bp)
    bp2 = _round_up(bp, bt)
    nb = bp2 // bt

    dsize = jnp.dtype(compute_dtype).itemsize
    if t_chunk is None:
        # Size the time chunk against a conservative VMEM budget (fits v5e's
        # 16 MiB scoped default and v7x's 64 MiB physical with headroom).
        budget = 6 << 20
        per_step = bt * (4 * hp * 4 + 2 * in8 * dsize)   # xp f32 + 2x x bufs
        t_chunk = max(1, budget // per_step)
    t_chunk = int(max(1, min(t_chunk, seq)))
    nt = pl.cdiv(seq, t_chunk)
    seq_p = nt * t_chunk

    # --- layout plumbing (zero padding keeps the math exact; padded timesteps
    #     are masked inside the kernel; padded batch rows are sliced off) ----
    x_tm = jnp.transpose(x, (1, 0, 2)).astype(compute_dtype)      # (seq, B, in)
    x_tm = jnp.pad(x_tm, ((0, seq_p - seq), (0, bp2 - batch), (0, in8 - in_size)))

    w_ih = jnp.pad(_pad_gate_cols(params["w_ih_T"], hidden, hp),
                   ((0, in8 - in_size), (0, 0))).astype(compute_dtype)
    w_hh = jnp.pad(_pad_gate_cols(params["w_hh_T"], hidden, hp),
                   ((0, hp - hidden), (0, 0))).astype(compute_dtype)
    bias = _pad_gate_cols(params["b"], hidden, hp).astype(jnp.float32)
    w_out = jnp.pad(params["w_out_T"],
                    ((0, hp - hidden), (0, op - out_size))).astype(compute_dtype)
    b_out = jnp.pad(params["b_out"],
                    ((0, 0), (0, op - out_size))).astype(jnp.float32)

    # explicit VMEM limit sized from the actual buffers (with headroom), capped
    # well under v7x's 64 MiB physical VMEM.
    in_bytes = 2 * (t_chunk * bt * in8 * dsize + in8 * 4 * hp * dsize
                    + hp * 4 * hp * dsize + 4 * hp * 4 + hp * op * dsize + op * 4)
    out_bytes = 2 * bt * op * 4
    scratch_bytes = t_chunk * bt * 4 * hp * 4 + 2 * bt * hp * 4
    vmem_limit = int(min(48 << 20,
                         max(16 << 20, 2 * (in_bytes + out_bytes + scratch_bytes))))

    kernel = _make_kernel(seq, t_chunk, bt, hp, nt)

    grid_spec = pltpu.PrefetchScalarGridSpec(
        num_scalar_prefetch=0,
        grid=(nb, nt),
        in_specs=[
            pl.BlockSpec((t_chunk, bt, in8), lambda bi, ti: (ti, bi, 0)),
            pl.BlockSpec((in8, 4 * hp), lambda bi, ti: (0, 0)),
            pl.BlockSpec((hp, 4 * hp), lambda bi, ti: (0, 0)),
            pl.BlockSpec((1, 4 * hp), lambda bi, ti: (0, 0)),
            pl.BlockSpec((hp, op), lambda bi, ti: (0, 0)),
            pl.BlockSpec((1, op), lambda bi, ti: (0, 0)),
        ],
        out_specs=pl.BlockSpec((bt, op), lambda bi, ti: (bi, 0)),
        scratch_shapes=[
            pltpu.VMEM((t_chunk * bt, 4 * hp), jnp.float32),   # per-chunk x@W_ih
            pltpu.VMEM((bt, hp), jnp.float32),                 # h state
            pltpu.VMEM((bt, hp), jnp.float32),                 # c state
        ],
    )

    y_full = pl.pallas_call(
        kernel,
        out_shape=jax.ShapeDtypeStruct((bp2, op), jnp.float32),
        grid_spec=grid_spec,
        compiler_params=pltpu.CompilerParams(
            dimension_semantics=("parallel", "arbitrary"),
            vmem_limit_bytes=vmem_limit),
    )(x_tm, w_ih, w_hh, bias, w_out, b_out)

    return y_full[:batch, :out_size]


def ref_forward(x, params, compute_dtype=jnp.float32):
    """Pure-JAX reference (torch LSTM + Linear math, eval mode).

    With compute_dtype=float32 this is the exact torch-equivalent math; with
    bfloat16 it mirrors the kernel's casts (bf16 matmul operands, f32
    accumulation and f32 elementwise), for a tight apples-to-apples check.
    """
    H = params["w_hh_T"].shape[0]
    w_ih = params["w_ih_T"].astype(compute_dtype)
    w_hh = params["w_hh_T"].astype(compute_dtype)
    w_out = params["w_out_T"].astype(compute_dtype)
    bias = params["b"][0]

    def step(carry, x_t):
        h, c = carry
        gates = (jnp.dot(x_t.astype(compute_dtype), w_ih,
                         preferred_element_type=jnp.float32)
                 + jnp.dot(h.astype(compute_dtype), w_hh,
                           preferred_element_type=jnp.float32)
                 + bias)
        i = jax.nn.sigmoid(gates[:, 0 * H:1 * H])
        f = jax.nn.sigmoid(gates[:, 1 * H:2 * H])
        g = jnp.tanh(gates[:, 2 * H:3 * H])
        o = jax.nn.sigmoid(gates[:, 3 * H:4 * H])
        c = f * c + i * g
        h = o * jnp.tanh(c)
        return (h, c), None

    B = x.shape[0]
    h0 = jnp.zeros((B, H), jnp.float32)
    c0 = jnp.zeros((B, H), jnp.float32)
    (h_n, _), _ = jax.lax.scan(step, (h0, c0), jnp.transpose(x, (1, 0, 2)))
    return (jnp.dot(h_n.astype(compute_dtype), w_out,
                    preferred_element_type=jnp.float32)
            + params["b_out"][0])


def init_params(key, in_size, hidden_size, out_size):
    ks = jax.random.split(key, 6)
    scale = 1.0 / jnp.sqrt(hidden_size)
    # stored transposed relative to torch: (in, 4H), (H, 4H), (H, out)
    w_ih_T = jax.random.uniform(ks[0], (in_size, 4 * hidden_size),
                                jnp.float32, -scale, scale)
    w_hh_T = jax.random.uniform(ks[1], (hidden_size, 4 * hidden_size),
                                jnp.float32, -scale, scale)
    b_ih = jax.random.uniform(ks[2], (4 * hidden_size,), jnp.float32, -scale, scale)
    b_hh = jax.random.uniform(ks[3], (4 * hidden_size,), jnp.float32, -scale, scale)
    w_out_T = jax.random.uniform(ks[4], (hidden_size, out_size),
                                 jnp.float32, -scale, scale)
    b_out = jax.random.uniform(ks[5], (out_size,), jnp.float32, -scale, scale)
    return {
        "w_ih_T": w_ih_T,
        "w_hh_T": w_hh_T,
        "b": (b_ih + b_hh).reshape(1, -1),
        "w_out_T": w_out_T,
        "b_out": b_out.reshape(1, -1),
    }


if __name__ == "__main__":
    batch, seq, in_size, hidden_size, out_size = 2, 8, 16, 32, 8

    key = jax.random.PRNGKey(0)
    k_x, k_x2, k_p = jax.random.split(key, 3)
    x = jax.random.normal(k_x, (batch, seq, in_size), jnp.float32)
    params = init_params(k_p, in_size, hidden_size, out_size)

    fwd = jax.jit(text_subnet_forward,
                  static_argnames=("t_chunk", "batch_tile", "compute_dtype"))

    # 1) f32 weights, 2 time chunks: exact parity with the torch-equivalent ref.
    y_f32 = jax.block_until_ready(
        fwd(x, params, t_chunk=4, compute_dtype=jnp.float32))
    y_ref = ref_forward(x, params)
    assert y_f32.shape == (batch, out_size)
    assert jnp.allclose(y_f32, y_ref, atol=1e-4, rtol=1e-4)

    # 2) bf16 weights (default), ragged time chunking (nt=3, masked tail step):
    #    compare tightly against a bf16-matched reference and loosely against
    #    the f32 reference (bf16 is a deliberate, small numerics change).
    y_bf16 = jax.block_until_ready(
        fwd(x, params, t_chunk=3, compute_dtype=jnp.bfloat16))
    y_ref_bf16 = ref_forward(x, params, compute_dtype=jnp.bfloat16)
    assert jnp.allclose(y_bf16, y_ref_bf16, atol=2e-3, rtol=2e-3)
    assert jnp.allclose(y_bf16, y_ref, atol=0.1, rtol=0.1)

    # 3) multi-tile batch axis (nb=2) + auto time chunk, f32 parity check.
    x2 = jax.random.normal(k_x2, (10, seq, in_size), jnp.float32)
    y2 = jax.block_until_ready(
        fwd(x2, params, batch_tile=8, compute_dtype=jnp.float32))
    y2_ref = ref_forward(x2, params)
    assert y2.shape == (10, out_size)
    assert jnp.allclose(y2, y2_ref, atol=1e-4, rtol=1e-4)

    print("KERNEL_OK")
</pallas_src>

<mosaic_0001>
module attributes {stable_mosaic.version = 11 : i64} {
  func.func @kernel(%arg0: i32, %arg1: i32, %arg2: memref<4x8x16xf32, #tpu.memory_space<vmem>>, %arg3: memref<16x512xf32, #tpu.memory_space<vmem>>, %arg4: memref<128x512xf32, #tpu.memory_space<vmem>>, %arg5: memref<1x512xf32, #tpu.memory_space<vmem>>, %arg6: memref<128x128xf32, #tpu.memory_space<vmem>>, %arg7: memref<1x128xf32, #tpu.memory_space<vmem>>, %arg8: memref<8x128xf32, #tpu.memory_space<vmem>>, %arg9: memref<32x512xf32, #tpu.memory_space<vmem>>, %arg10: memref<8x128xf32, #tpu.memory_space<vmem>>, %arg11: memref<8x128xf32, #tpu.memory_space<vmem>>) attributes {dimension_semantics = [#tpu.dimension_semantics<parallel>, #tpu.dimension_semantics<arbitrary>], iteration_bounds = array<i64: 1, 2>, scalar_prefetch = 0 : i64, scratch_operands = 3 : i64, tpu.core_type = #tpu.core_type<tc>, window_params = [{transform_indices = @transform_0, window_bounds = array<i64: 4, 8, 16>}, {pipeline_mode = #tpu.pipeline_mode<synchronous>, transform_indices = @transform_1, window_bounds = array<i64: 16, 512>}, {pipeline_mode = #tpu.pipeline_mode<synchronous>, transform_indices = @transform_2, window_bounds = array<i64: 128, 512>}, {pipeline_mode = #tpu.pipeline_mode<synchronous>, transform_indices = @transform_3, window_bounds = array<i64: 1, 512>}, {pipeline_mode = #tpu.pipeline_mode<synchronous>, transform_indices = @transform_4, window_bounds = array<i64: 128, 128>}, {pipeline_mode = #tpu.pipeline_mode<synchronous>, transform_indices = @transform_5, window_bounds = array<i64: 1, 128>}, {transform_indices = @transform_6, window_bounds = array<i64: 8, 128>}]} {
    %c0_i32 = arith.constant 0 : i32
    %0 = arith.cmpi eq, %arg1, %c0_i32 : i32
    %1 = arith.extui %0 : i1 to i32
    %c0_i32_0 = arith.constant 0 : i32
    %2 = arith.cmpi ne, %1, %c0_i32_0 : i32
    scf.if %2 {
      %cst_75 = arith.constant 0.000000e+00 : f32
      %170 = vector.broadcast %cst_75 : f32 to vector<8x128xf32>
      %c0_76 = arith.constant 0 : index
      %c0_77 = arith.constant 0 : index
      %171 = vector.load %arg10[%c0_76, %c0_77] : memref<8x128xf32, #tpu.memory_space<vmem>>, vector<8x128xf32>
      tpu.vector_store %arg10[%c0_76, %c0_77], %170 {strides = array<i32>} : memref<8x128xf32, #tpu.memory_space<vmem>>, vector<8x128xf32>,
      %cst_78 = arith.constant 0.000000e+00 : f32
      %172 = vector.broadcast %cst_78 : f32 to vector<8x128xf32>
      %c0_79 = arith.constant 0 : index
      %c0_80 = arith.constant 0 : index
      %173 = vector.load %arg11[%c0_79, %c0_80] : memref<8x128xf32, #tpu.memory_space<vmem>>, vector<8x128xf32>
      tpu.vector_store %arg11[%c0_79, %c0_80], %172 {strides = array<i32>} : memref<8x128xf32, #tpu.memory_space<vmem>>, vector<8x128xf32>,
    } else {
    }
    %c0 = arith.constant 0 : index
    %c0_1 = arith.constant 0 : index
    %c0_2 = arith.constant 0 : index
    %3 = vector.load %arg2[%c0, %c0_1, %c0_2] : memref<4x8x16xf32, #tpu.memory_space<vmem>>, vector<4x8x16xf32>
    %4 = vector.shape_cast %3 : vector<4x8x16xf32> to vector<32x16xf32>
    %c0_3 = arith.constant 0 : index
    %c0_4 = arith.constant 0 : index
    %5 = vector.load %arg3[%c0_3, %c0_4] : memref<16x512xf32, #tpu.memory_space<vmem>>, vector<16x512xf32>
    %cst = arith.constant dense<0.000000e+00> : vector<32x512xf32>
    %6 = tpu.matmul %4, %5, %cst {dimension_numbers = #tpu.dot_dimension_numbers<[1], [0], [0], [1], [0, 0, 1, 1], [], []>} : vector<32x16xf32>, vector<16x512xf32>, vector<32x512xf32> -> vector<32x512xf32>
    %c0_5 = arith.constant 0 : index
    %c0_6 = arith.constant 0 : index
    %7 = vector.load %arg5[%c0_5, %c0_6] : memref<1x512xf32, #tpu.memory_space<vmem>>, vector<1x512xf32>
    %8 = vector.broadcast %7 : vector<1x512xf32> to vector<32x512xf32>
    %9 = arith.addf %6, %8 : vector<32x512xf32>
    %c0_7 = arith.constant 0 : index
    %c0_8 = arith.constant 0 : index
    %10 = vector.load %arg9[%c0_7, %c0_8] : memref<32x512xf32, #tpu.memory_space<vmem>>, vector<32x512xf32>
    tpu.vector_store %arg9[%c0_7, %c0_8], %9 {strides = array<i32>} : memref<32x512xf32, #tpu.memory_space<vmem>>, vector<32x512xf32>,
    %c0_9 = arith.constant 0 : index
    %c0_10 = arith.constant 0 : index
    %11 = vector.load %arg10[%c0_9, %c0_10] : memref<8x128xf32, #tpu.memory_space<vmem>>, vector<8x128xf32>
    %c0_11 = arith.constant 0 : index
    %c0_12 = arith.constant 0 : index
    %12 = vector.load %arg11[%c0_11, %c0_12] : memref<8x128xf32, #tpu.memory_space<vmem>>, vector<8x128xf32>
    %c0_i32_13 = arith.constant 0 : i32
    %c8_i32 = arith.constant 8 : i32
    %13 = arith.muli %c0_i32_13, %c8_i32 : i32
    %14 = tpu.assume_multiple %13, 8 : i32
    %15 = arith.index_cast %14 : i32 to index
    %c0_14 = arith.constant 0 : index
    %16 = vector.load %arg9[%15, %c0_14] : memref<32x512xf32, #tpu.memory_space<vmem>>, vector<8x512xf32>
    %c0_15 = arith.constant 0 : index
    %c0_16 = arith.constant 0 : index
    %17 = vector.load %arg4[%c0_15, %c0_16] : memref<128x512xf32, #tpu.memory_space<vmem>>, vector<128x512xf32>
    %cst_17 = arith.constant dense<0.000000e+00> : vector<8x512xf32>
    %18 = tpu.matmul %11, %17, %cst_17 {dimension_numbers = #tpu.dot_dimension_numbers<[1], [0], [0], [1], [0, 0, 1, 1], [], []>} : vector<8x128xf32>, vector<128x512xf32>, vector<8x512xf32> -> vector<8x512xf32>
    %19 = arith.addf %16, %18 : vector<8x512xf32>
    %20 = vector.extract_strided_slice %19 {offsets = [0, 0], sizes = [8, 128], strides = [1, 1]} : vector<8x512xf32> to vector<8x128xf32>
    %cst_18 = arith.constant 5.000000e-01 : f32
    %21 = vector.broadcast %cst_18 : f32 to vector<8x128xf32>
    %22 = arith.mulf %21, %20 : vector<8x128xf32>
    %23 = math.tanh %22 : vector<8x128xf32>
    %cst_19 = arith.constant 1.000000e+00 : f32
    %24 = vector.broadcast %cst_19 : f32 to vector<8x128xf32>
    %25 = arith.addf %24, %23 : vector<8x128xf32>
    %cst_20 = arith.constant 5.000000e-01 : f32
    %26 = vector.broadcast %cst_20 : f32 to vector<8x128xf32>
    %27 = arith.mulf %26, %25 : vector<8x128xf32>
    %28 = vector.extract_strided_slice %19 {offsets = [0, 128], sizes = [8, 128], strides = [1, 1]} : vector<8x512xf32> to vector<8x128xf32>
    %cst_21 = arith.constant 5.000000e-01 : f32
    %29 = vector.broadcast %cst_21 : f32 to vector<8x128xf32>
    %30 = arith.mulf %29, %28 : vector<8x128xf32>
    %31 = math.tanh %30 : vector<8x128xf32>
    %cst_22 = arith.constant 1.000000e+00 : f32
    %32 = vector.broadcast %cst_22 : f32 to vector<8x128xf32>
    %33 = arith.addf %32, %31 : vector<8x128xf32>
    %cst_23 = arith.constant 5.000000e-01 : f32
    %34 = vector.broadcast %cst_23 : f32 to vector<8x128xf32>
    %35 = arith.mulf %34, %33 : vector<8x128xf32>
    %36 = vector.extract_strided_slice %19 {offsets = [0, 256], sizes = [8, 128], strides = [1, 1]} : vector<8x512xf32> to vector<8x128xf32>
    %37 = math.tanh %36 : vector<8x128xf32>
    %38 = vector.extract_strided_slice %19 {offsets = [0, 384], sizes = [8, 128], strides = [1, 1]} : vector<8x512xf32> to vector<8x128xf32>
    %cst_24 = arith.constant 5.000000e-01 : f32
    %39 = vector.broadcast %cst_24 : f32 to vector<8x128xf32>
    %40 = arith.mulf %39, %38 : vector<8x128xf32>
    %41 = math.tanh %40 : vector<8x128xf32>
    %cst_25 = arith.constant 1.000000e+00 : f32
    %42 = vector.broadcast %cst_25 : f32 to vector<8x128xf32>
    %43 = arith.addf %42, %41 : vector<8x128xf32>
    %cst_26 = arith.constant 5.000000e-01 : f32
    %44 = vector.broadcast %cst_26 : f32 to vector<8x128xf32>
    %45 = arith.mulf %44, %43 : vector<8x128xf32>
    %46 = arith.mulf %35, %12 : vector<8x128xf32>
    %47 = arith.mulf %27, %37 : vector<8x128xf32>
    %48 = arith.addf %46, %47 : vector<8x128xf32>
    %49 = math.tanh %48 : vector<8x128xf32>
    %50 = arith.mulf %45, %49 : vector<8x128xf32>
    %c1_i32 = arith.constant 1 : i32
    %c8_i32_27 = arith.constant 8 : i32
    %51 = arith.muli %c1_i32, %c8_i32_27 : i32
    %52 = tpu.assume_multiple %51, 8 : i32
    %53 = arith.index_cast %52 : i32 to index
    %c0_28 = arith.constant 0 : index
    %54 = vector.load %arg9[%53, %c0_28] : memref<32x512xf32, #tpu.memory_space<vmem>>, vector<8x512xf32>
    %c0_29 = arith.constant 0 : index
    %c0_30 = arith.constant 0 : index
    %55 = vector.load %arg4[%c0_29, %c0_30] : memref<128x512xf32, #tpu.memory_space<vmem>>, vector<128x512xf32>
    %cst_31 = arith.constant dense<0.000000e+00> : vector<8x512xf32>
    %56 = tpu.matmul %50, %55, %cst_31 {dimension_numbers = #tpu.dot_dimension_numbers<[1], [0], [0], [1], [0, 0, 1, 1], [], []>} : vector<8x128xf32>, vector<128x512xf32>, vector<8x512xf32> -> vector<8x512xf32>
    %57 = arith.addf %54, %56 : vector<8x512xf32>
    %58 = vector.extract_strided_slice %57 {offsets = [0, 0], sizes = [8, 128], strides = [1, 1]} : vector<8x512xf32> to vector<8x128xf32>
    %cst_32 = arith.constant 5.000000e-01 : f32
    %59 = vector.broadcast %cst_32 : f32 to vector<8x128xf32>
    %60 = arith.mulf %59, %58 : vector<8x128xf32>
    %61 = math.tanh %60 : vector<8x128xf32>
    %cst_33 = arith.constant 1.000000e+00 : f32
    %62 = vector.broadcast %cst_33 : f32 to vector<8x128xf32>
    %63 = arith.addf %62, %61 : vector<8x128xf32>
    %cst_34 = arith.constant 5.000000e-01 : f32
    %64 = vector.broadcast %cst_34 : f32 to vector<8x128xf32>
    %65 = arith.mulf %64, %63 : vector<8x128xf32>
    %66 = vector.extract_strided_slice %57 {offsets = [0, 128], sizes = [8, 128], strides = [1, 1]} : vector<8x512xf32> to vector<8x128xf32>
    %cst_35 = arith.constant 5.000000e-01 : f32
    %67 = vector.broadcast %cst_35 : f32 to vector<8x128xf32>
    %68 = arith.mulf %67, %66 : vector<8x128xf32>
    %69 = math.tanh %68 : vector<8x128xf32>
    %cst_36 = arith.constant 1.000000e+00 : f32
    %70 = vector.broadcast %cst_36 : f32 to vector<8x128xf32>
    %71 = arith.addf %70, %69 : vector<8x128xf32>
    %cst_37 = arith.constant 5.000000e-01 : f32
    %72 = vector.broadcast %cst_37 : f32 to vector<8x128xf32>
    %73 = arith.mulf %72, %71 : vector<8x128xf32>
    %74 = vector.extract_strided_slice %57 {offsets = [0, 256], sizes = [8, 128], strides = [1, 1]} : vector<8x512xf32> to vector<8x128xf32>
    %75 = math.tanh %74 : vector<8x128xf32>
    %76 = vector.extract_strided_slice %57 {offsets = [0, 384], sizes = [8, 128], strides = [1, 1]} : vector<8x512xf32> to vector<8x128xf32>
    %cst_38 = arith.constant 5.000000e-01 : f32
    %77 = vector.broadcast %cst_38 : f32 to vector<8x128xf32>
    %78 = arith.mulf %77, %76 : vector<8x128xf32>
    %79 = math.tanh %78 : vector<8x128xf32>
    %cst_39 = arith.constant 1.000000e+00 : f32
    %80 = vector.broadcast %cst_39 : f32 to vector<8x128xf32>
    %81 = arith.addf %80, %79 : vector<8x128xf32>
    %cst_40 = arith.constant 5.000000e-01 : f32
    %82 = vector.broadcast %cst_40 : f32 to vector<8x128xf32>
    %83 = arith.mulf %82, %81 : vector<8x128xf32>
    %84 = arith.mulf %73, %48 : vector<8x128xf32>
    %85 = arith.mulf %65, %75 : vector<8x128xf32>
    %86 = arith.addf %84, %85 : vector<8x128xf32>
    %87 = math.tanh %86 : vector<8x128xf32>
    %88 = arith.mulf %83, %87 : vector<8x128xf32>
    %c2_i32 = arith.constant 2 : i32
    %c8_i32_41 = arith.constant 8 : i32
    %89 = arith.muli %c2_i32, %c8_i32_41 : i32
    %90 = tpu.assume_multiple %89, 8 : i32
    %91 = arith.index_cast %90 : i32 to index
    %c0_42 = arith.constant 0 : index
    %92 = vector.load %arg9[%91, %c0_42] : memref<32x512xf32, #tpu.memory_space<vmem>>, vector<8x512xf32>
    %c0_43 = arith.constant 0 : index
    %c0_44 = arith.constant 0 : index
    %93 = vector.load %arg4[%c0_43, %c0_44] : memref<128x512xf32, #tpu.memory_space<vmem>>, vector<128x512xf32>
    %cst_45 = arith.constant dense<0.000000e+00> : vector<8x512xf32>
    %94 = tpu.matmul %88, %93, %cst_45 {dimension_numbers = #tpu.dot_dimension_numbers<[1], [0], [0], [1], [0, 0, 1, 1], [], []>} : vector<8x128xf32>, vector<128x512xf32>, vector<8x512xf32> -> vector<8x512xf32>
    %95 = arith.addf %92, %94 : vector<8x512xf32>
    %96 = vector.extract_strided_slice %95 {offsets = [0, 0], sizes = [8, 128], strides = [1, 1]} : vector<8x512xf32> to vector<8x128xf32>
    %cst_46 = arith.constant 5.000000e-01 : f32
    %97 = vector.broadcast %cst_46 : f32 to vector<8x128xf32>
    %98 = arith.mulf %97, %96 : vector<8x128xf32>
    %99 = math.tanh %98 : vector<8x128xf32>
    %cst_47 = arith.constant 1.000000e+00 : f32
    %100 = vector.broadcast %cst_47 : f32 to vector<8x128xf32>
    %101 = arith.addf %100, %99 : vector<8x128xf32>
    %cst_48 = arith.constant 5.000000e-01 : f32
    %102 = vector.broadcast %cst_48 : f32 to vector<8x128xf32>
    %103 = arith.mulf %102, %101 : vector<8x128xf32>
    %104 = vector.extract_strided_slice %95 {offsets = [0, 128], sizes = [8, 128], strides = [1, 1]} : vector<8x512xf32> to vector<8x128xf32>
    %cst_49 = arith.constant 5.000000e-01 : f32
    %105 = vector.broadcast %cst_49 : f32 to vector<8x128xf32>
    %106 = arith.mulf %105, %104 : vector<8x128xf32>
    %107 = math.tanh %106 : vector<8x128xf32>
    %cst_50 = arith.constant 1.000000e+00 : f32
    %108 = vector.broadcast %cst_50 : f32 to vector<8x128xf32>
    %109 = arith.addf %108, %107 : vector<8x128xf32>
    %cst_51 = arith.constant 5.000000e-01 : f32
    %110 = vector.broadcast %cst_51 : f32 to vector<8x128xf32>
    %111 = arith.mulf %110, %109 : vector<8x128xf32>
    %112 = vector.extract_strided_slice %95 {offsets = [0, 256], sizes = [8, 128], strides = [1, 1]} : vector<8x512xf32> to vector<8x128xf32>
    %113 = math.tanh %112 : vector<8x128xf32>
    %114 = vector.extract_strided_slice %95 {offsets = [0, 384], sizes = [8, 128], strides = [1, 1]} : vector<8x512xf32> to vector<8x128xf32>
    %cst_52 = arith.constant 5.000000e-01 : f32
    %115 = vector.broadcast %cst_52 : f32 to vector<8x128xf32>
    %116 = arith.mulf %115, %114 : vector<8x128xf32>
    %117 = math.tanh %116 : vector<8x128xf32>
    %cst_53 = arith.constant 1.000000e+00 : f32
    %118 = vector.broadcast %cst_53 : f32 to vector<8x128xf32>
    %119 = arith.addf %118, %117 : vector<8x128xf32>
    %cst_54 = arith.constant 5.000000e-01 : f32
    %120 = vector.broadcast %cst_54 : f32 to vector<8x128xf32>
    %121 = arith.mulf %120, %119 : vector<8x128xf32>
    %122 = arith.mulf %111, %86 : vector<8x128xf32>
    %123 = arith.mulf %103, %113 : vector<8x128xf32>
    %124 = arith.addf %122, %123 : vector<8x128xf32>
    %125 = math.tanh %124 : vector<8x128xf32>
    %126 = arith.mulf %121, %125 : vector<8x128xf32>
    %c3_i32 = arith.constant 3 : i32
    %c8_i32_55 = arith.constant 8 : i32
    %127 = arith.muli %c3_i32, %c8_i32_55 : i32
    %128 = tpu.assume_multiple %127, 8 : i32
    %129 = arith.index_cast %128 : i32 to index
    %c0_56 = arith.constant 0 : index
    %130 = vector.load %arg9[%129, %c0_56] : memref<32x512xf32, #tpu.memory_space<vmem>>, vector<8x512xf32>
    %c0_57 = arith.constant 0 : index
    %c0_58 = arith.constant 0 : index
    %131 = vector.load %arg4[%c0_57, %c0_58] : memref<128x512xf32, #tpu.memory_space<vmem>>, vector<128x512xf32>
    %cst_59 = arith.constant dense<0.000000e+00> : vector<8x512xf32>
    %132 = tpu.matmul %126, %131, %cst_59 {dimension_numbers = #tpu.dot_dimension_numbers<[1], [0], [0], [1], [0, 0, 1, 1], [], []>} : vector<8x128xf32>, vector<128x512xf32>, vector<8x512xf32> -> vector<8x512xf32>
    %133 = arith.addf %130, %132 : vector<8x512xf32>
    %134 = vector.extract_strided_slice %133 {offsets = [0, 0], sizes = [8, 128], strides = [1, 1]} : vector<8x512xf32> to vector<8x128xf32>
    %cst_60 = arith.constant 5.000000e-01 : f32
    %135 = vector.broadcast %cst_60 : f32 to vector<8x128xf32>
    %136 = arith.mulf %135, %134 : vector<8x128xf32>
    %137 = math.tanh %136 : vector<8x128xf32>
    %cst_61 = arith.constant 1.000000e+00 : f32
    %138 = vector.broadcast %cst_61 : f32 to vector<8x128xf32>
    %139 = arith.addf %138, %137 : vector<8x128xf32>
    %cst_62 = arith.constant 5.000000e-01 : f32
    %140 = vector.broadcast %cst_62 : f32 to vector<8x128xf32>
    %141 = arith.mulf %140, %139 : vector<8x128xf32>
    %142 = vector.extract_strided_slice %133 {offsets = [0, 128], sizes = [8, 128], strides = [1, 1]} : vector<8x512xf32> to vector<8x128xf32>
    %cst_63 = arith.constant 5.000000e-01 : f32
    %143 = vector.broadcast %cst_63 : f32 to vector<8x128xf32>
    %144 = arith.mulf %143, %142 : vector<8x128xf32>
    %145 = math.tanh %144 : vector<8x128xf32>
    %cst_64 = arith.constant 1.000000e+00 : f32
    %146 = vector.broadcast %cst_64 : f32 to vector<8x128xf32>
    %147 = arith.addf %146, %145 : vector<8x128xf32>
    %cst_65 = arith.constant 5.000000e-01 : f32
    %148 = vector.broadcast %cst_65 : f32 to vector<8x128xf32>
    %149 = arith.mulf %148, %147 : vector<8x128xf32>
    %150 = vector.extract_strided_slice %133 {offsets = [0, 256], sizes = [8, 128], strides = [1, 1]} : vector<8x512xf32> to vector<8x128xf32>
    %151 = math.tanh %150 : vector<8x128xf32>
    %152 = vector.extract_strided_slice %133 {offsets = [0, 384], sizes = [8, 128], strides = [1, 1]} : vector<8x512xf32> to vector<8x128xf32>
    %cst_66 = arith.constant 5.000000e-01 : f32
    %153 = vector.broadcast %cst_66 : f32 to vector<8x128xf32>
    %154 = arith.mulf %153, %152 : vector<8x128xf32>
    %155 = math.tanh %154 : vector<8x128xf32>
    %cst_67 = arith.constant 1.000000e+00 : f32
    %156 = vector.broadcast %cst_67 : f32 to vector<8x128xf32>
    %157 = arith.addf %156, %155 : vector<8x128xf32>
    %cst_68 = arith.constant 5.000000e-01 : f32
    %158 = vector.broadcast %cst_68 : f32 to vector<8x128xf32>
    %159 = arith.mulf %158, %157 : vector<8x128xf32>
    %160 = arith.mulf %149, %124 : vector<8x128xf32>
    %161 = arith.mulf %141, %151 : vector<8x128xf32>
    %162 = arith.addf %160, %161 : vector<8x128xf32>
    %163 = math.tanh %162 : vector<8x128xf32>
    %164 = arith.mulf %159, %163 : vector<8x128xf32>
    %c4_i32 = arith.constant 4 : i32
    %c0_69 = arith.constant 0 : index
    %c0_70 = arith.constant 0 : index
    %165 = vector.load %arg10[%c0_69, %c0_70] : memref<8x128xf32, #tpu.memory_space<vmem>>, vector<8x128xf32>
    tpu.vector_store %arg10[%c0_69, %c0_70], %164 {strides = array<i32>} : memref<8x128xf32, #tpu.memory_space<vmem>>, vector<8x128xf32>,
    %c0_71 = arith.constant 0 : index
    %c0_72 = arith.constant 0 : index
    %166 = vector.load %arg11[%c0_71, %c0_72] : memref<8x128xf32, #tpu.memory_space<vmem>>, vector<8x128xf32>
    tpu.vector_store %arg11[%c0_71, %c0_72], %162 {strides = array<i32>} : memref<8x128xf32, #tpu.memory_space<vmem>>, vector<8x128xf32>,
    %c1_i32_73 = arith.constant 1 : i32
    %167 = arith.cmpi eq, %arg1, %c1_i32_73 : i32
    %168 = arith.extui %167 : i1 to i32
    %c0_i32_74 = arith.constant 0 : i32
    %169 = arith.cmpi ne, %168, %c0_i32_74 : i32
    scf.if %169 {
      %c0_75 = arith.constant 0 : index
      %c0_76 = arith.constant 0 : index
      %170 = vector.load %arg6[%c0_75, %c0_76] : memref<128x128xf32, #tpu.memory_space<vmem>>, vector<128x128xf32>
      %cst_77 = arith.constant dense<0.000000e+00> : vector<8x128xf32>
      %171 = tpu.matmul %164, %170, %cst_77 {dimension_numbers = #tpu.dot_dimension_numbers<[1], [0], [0], [1], [0, 0, 1, 1], [], []>} : vector<8x128xf32>, vector<128x128xf32>, vector<8x128xf32> -> vector<8x128xf32>
      %c0_78 = arith.constant 0 : index
      %c0_79 = arith.constant 0 : index
      %172 = vector.load %arg7[%c0_78, %c0_79] : memref<1x128xf32, #tpu.memory_space<vmem>>, vector<1x128xf32>
      %173 = vector.broadcast %172 : vector<1x128xf32> to vector<8x128xf32>
      %174 = arith.addf %171, %173 : vector<8x128xf32>
      %c0_80 = arith.constant 0 : index
      %c0_81 = arith.constant 0 : index
      %175 = vector.load %arg8[%c0_80, %c0_81] : memref<8x128xf32, #tpu.memory_space<vmem>>, vector<8x128xf32>
      tpu.vector_store %arg8[%c0_80, %c0_81], %174 {strides = array<i32>} : memref<8x128xf32, #tpu.memory_space<vmem>>, vector<8x128xf32>,
    } else {
    }
    return
  }
  func.func @transform_0(%arg0: i32, %arg1: i32) -> (i32, i32, i32) {
    %c0_i32 = arith.constant 0 : i32
    %c0_i32_0 = arith.constant 0 : i32
    return %arg1, %arg0, %c0_i32 : i32, i32, i32
  }
  func.func @transform_1(%arg0: i32, %arg1: i32) -> (i32, i32) {
    %c0_i32 = arith.constant 0 : i32
    %c0_i32_0 = arith.constant 0 : i32
    %c0_i32_1 = arith.constant 0 : i32
    return %c0_i32, %c0_i32_0 : i32, i32
  }
  func.func @transform_2(%arg0: i32, %arg1: i32) -> (i32, i32) {
    %c0_i32 = arith.constant 0 : i32
    %c0_i32_0 = arith.constant 0 : i32
    %c0_i32_1 = arith.constant 0 : i32
    return %c0_i32, %c0_i32_0 : i32, i32
  }
  func.func @transform_3(%arg0: i32, %arg1: i32) -> (i32, i32) {
    %c0_i32 = arith.constant 0 : i32
    %c0_i32_0 = arith.constant 0 : i32
    %c0_i32_1 = arith.constant 0 : i32
    return %c0_i32, %c0_i32_0 : i32, i32
  }
  func.func @transform_4(%arg0: i32, %arg1: i32) -> (i32, i32) {
    %c0_i32 = arith.constant 0 : i32
    %c0_i32_0 = arith.constant 0 : i32
    %c0_i32_1 = arith.constant 0 : i32
    return %c0_i32, %c0_i32_0 : i32, i32
  }
  func.func @transform_5(%arg0: i32, %arg1: i32) -> (i32, i32) {
    %c0_i32 = arith.constant 0 : i32
    %c0_i32_0 = arith.constant 0 : i32
    %c0_i32_1 = arith.constant 0 : i32
    return %c0_i32, %c0_i32_0 : i32, i32
  }
  func.func @transform_6(%arg0: i32, %arg1: i32) -> (i32, i32) {
    %c0_i32 = arith.constant 0 : i32
    %c0_i32_0 = arith.constant 0 : i32
    return %arg0, %c0_i32 : i32, i32
  }
}

</mosaic_0001>

<bundles_post_ra>
// kernel: text_subnet_forward.1
= control target key start
LH: loop header
LB: loop body
LE: loop exit
PB: predicated region body
PF: predicated region fallthrough
CT: control target
= control target key end

     0   :  { %s1962_s21 = smov 0   ;;  %s1964_s22 = smov 0   ;;  %s2524_s0 = inlined_call_operand.vmem [shape: f32[8,8,16], index: 0, kind: input, shape index: {}]   ;;  %s2525_s1 = inlined_call_operand.vmem [shape: f32[16,512], index: 1, kind: input, shape index: {}]   ;;  %s2526_s2 = inlined_call_operand.vmem [shape: f32[128,512], index: 2, kind: input, shape index: {}]   ;;  %s2527_s3 = inlined_call_operand.vmem [shape: f32[1,512], index: 3, kind: input, shape index: {}]   ;;  %s2528_s4 = inlined_call_operand.vmem [shape: f32[128,128], index: 4, kind: input, shape index: {}]   ;;  %s2529_s5 = inlined_call_operand.vmem [shape: f32[1,128], index: 5, kind: input, shape index: {}]   ;;  %s2530_s6 = inlined_call_operand.vmem [shape: f32[8,128], index: 6, kind: output, shape index: {}]  }
   0x1   :  { %s1966_s23 = smov 0  }
   0x2 LB: > { %s25_s24 = sadd.s32 1, %s1916_s22  ;;  %p1440_p0 = scmp.ge.s32.totalorder %s1920_s23, 1  ;;  %s1920_s23 = sphi %s1966_s23, %s16_s23   ;;  %s1916_s22 = sphi %s1964_s22, %s2532_s22   ;;  %s1912_s21 = sphi %s1962_s21, %s2531_s21  }
   0x3   : > { %p26_p1 = scmp.ge.s32.totalorder %s25_s24, 2  ;;  %p230_p2 = scmp.lt.s32.totalorder %s1920_s23, 3 }
   0x5   : > { %s2534_s24 = smov (%p26_p1, %s25_s24), 0  ;;  %p231_p3 = pnand %p1440_p0, %p230_p2 }
   0x6   : > { %s1441_s25 = sshll.u32 (!%p231_p3), %s1912_s21, 2  ;;  %p1443_p5 = scmp.ne.s32.totalorder (!%p231_p3), %s1912_s21, 0 }
   0x7   : > { %234 = sbr.rel (%p231_p3) target bundleno = 1272 (0x4f8), region = 44  ;;  %p263_p4 = scmp.lt.s32.totalorder (!%p231_p3), %s1441_s25, 7 }
   0xe   : > { %s2536_s25 = smov (!%p263_p4, %s1441_s25), 7  ;;  %278 = sbr.rel (%p1443_p5) target bundleno = 21 (0x15), region = 48 }
   0xf   : > { %s1442_s26 = sshll.u32 %s2536_s25, 3  ;;  %v1922_v0 = vmov (!%p1443_p5), 0.0  }
  0x10   : > { %s1986_s29 = scalar_lea.vmem %s2524_s0, %s1442_s26  ;;  %279 = vst [vmem:[#allocation3] sm:$0xff] (!%p1443_p5), %v1922_v0  ;;  %280 = vst [vmem:[#allocation4] sm:$0xff] (!%p1443_p5), %v1922_v0 }
  0x15 PF: > { %v286_v1 = vld [vmem:[%s2525_s1 + $0x8] sm:$0xff]  ;;  %v288_v3 = vld [vmem:[%s2525_s1 + $0x18] sm:$0xff]  ;;  %v285_v6 = vld [vmem:[%s2525_s1] sm:$0xff]  ;;  %v1923_v8 = vmov 0.0   ;;  %vm315_vm0 = vcmask 130048   ;;  %p1452_p6 = scmp.ne.s32.totalorder %s1912_s21, 1 }
  0x16   : > { %v290_v2 = vld [vmem:[%s2525_s1 + $0x28] sm:$0xff]  ;;  %v292_v5 = vld [vmem:[%s2525_s1 + $0x38] sm:$0xff]  ;;  %v289_v7 = vld [vmem:[%s2525_s1 + $0x20] sm:$0xff]  ;;  %392 = vmatprep.mubr.f32.mxu0 %v1923_v8  ;;  %481 = vmatprep.mubr.f32.mxu1 %v1923_v8  ;;  %vm1925_vm1 = vmmov (!%p1452_p6), 0  }
  0x17   : > { %v1509_v4 = vpack.c.bf16 %v290_v2, %v286_v1  ;;  %v1513_v9 = vpack.c.bf16 %v292_v5, %v288_v3  ;;  %v1511_v10 = vpack.c.bf16 %v289_v7, %v285_v6  ;;  %v287_v11 = vld [vmem:[%s2525_s1 + $0x10] sm:$0xff]  ;;  %v532_v13 = vld [vmem:[%s2526_s2 + $0x8] sm:$0xff]  ;;  %v534_v16 = vld [vmem:[%s2526_s2 + $0x18] sm:$0xff] }
  0x18   : > { %v291_v12 = vld [vmem:[%s2525_s1 + $0x30] sm:$0xff]  ;;  %v536_v15 = vld [vmem:[%s2526_s2 + $0x28] sm:$0xff]  ;;  %v538_v17 = vld [vmem:[%s2526_s2 + $0x38] sm:$0xff] }
  0x19   : > { %1510 = vmatprep.subr.bf16.mxu0 %v1509_v4  ;;  %v1515_v14 = vpack.c.bf16 %v291_v12, %v287_v11  ;;  %1514 = vmatprep.subr.bf16.mxu1 %v1513_v9  ;;  %v2027_v18 = vpack.c.bf16 %v536_v15, %v532_v13  ;;  %v2029_v19 = vpack.c.bf16 %v538_v17, %v534_v16  ;;  %v281_v20 = vld [vmem:[%s1986_s29] sm:$0xff]  ;;  %v533_v24 = vld [vmem:[%s2526_s2 + $0x10] sm:$0xff]  ;;  %v540_v26 = vld [vmem:[%s2526_s2 + $0x48] sm:$0xff] }
  0x1a   : > { %1512 = vmatpush1.bf16.msra.mxu0 %v1511_v10  ;;  %v531_v21 = vld [vmem:[%s2526_s2] sm:$0xff]  ;;  %v537_v25 = vld [vmem:[%s2526_s2 + $0x30] sm:$0xff]  ;;  %v544_v28 = vld [vmem:[%s2526_s2 + $0x68] sm:$0xff] }
  0x1b   : > { %v535_v22 = vld [vmem:[%s2526_s2 + $0x20] sm:$0xff]  ;;  %1516 = vmatpush1.bf16.msra.mxu1 %v1515_v14  ;;  %1518 = vmatprep.subr.bf16.mxu0 %v2027_v18  ;;  %v2051_v27 = vpack.c.bf16 %v537_v25, %v533_v24  ;;  %v542_v29 = vld [vmem:[%s2526_s2 + $0x58] sm:$0xff]  ;;  %v2063_v31 = vpack.c.bf16 %v544_v28, %v540_v26  ;;  %v541_v35 = vld [vmem:[%s2526_s2 + $0x50] sm:$0xff] }
  0x1c   : > { %v2038_v23 = vpack.c.bf16 %v535_v22, %v531_v21  ;;  %1550 = vmatprep.subr.bf16.mxu1 %v2029_v19  ;;  %v546_v30 = vld [vmem:[%s2526_s2 + $0x78] sm:$0xff]  ;;  %v539_v33 = vld [vmem:[%s2526_s2 + $0x40] sm:$0xff]  ;;  %v545_v37 = vld [vmem:[%s2526_s2 + $0x70] sm:$0xff] }
  0x1d   : > { %1444 = vmatmul.mubr.msk.f32.vlgmr.msra.gmra.mrb[0].mxu0 %vm315_vm0, %v281_v20  ;;  %v2065_v32 = vpack.c.bf16 %v546_v30, %v542_v29  ;;  %v543_v34 = vld [vmem:[%s2526_s2 + $0x60] sm:$0xff]  ;;  %v548_v38 = vld [vmem:[%s2526_s2 + $0x88] sm:$0xff]  ;;  %v2091_v40 = vpack.c.bf16 %v545_v37, %v541_v35  ;;  %v550_v42 = vld [vmem:[%s2526_s2 + $0x98] sm:$0xff] }
  0x1e   : > { %1448 = vmatmul.mubr.msk.f32.vlgmr.msra.gmra.mrb[0].mxu1 %vm315_vm0, %v281_v20  ;;  %1520 = vmatpush1.bf16.msra.mxu0 %v2038_v23  ;;  %v2078_v36 = vpack.c.bf16 %v543_v34, %v539_v33  ;;  %v552_v39 = vld [vmem:[%s2526_s2 + $0xa8] sm:$0xff]  ;;  %v554_v43 = vld [vmem:[%s2526_s2 + $0xb8] sm:$0xff]  ;;  %v547_v44 = vld [vmem:[%s2526_s2 + $0x80] sm:$0xff] }
  0x1f   : > { %1552 = vmatpush1.bf16.msra.mxu1 %v2051_v27  ;;  %1522 = vmatprep.subr.bf16.mxu0 %v2063_v31  ;;  %v2093_v41 = vpack.c.bf16 %v552_v39, %v548_v38  ;;  %v2105_v45 = vpack.c.bf16 %v554_v43, %v550_v42  ;;  %v551_v46 = vld [vmem:[%s2526_s2 + $0xa0] sm:$0xff]  ;;  %v549_v47 = vld [vmem:[%s2526_s2 + $0x90] sm:$0xff]  ;;  %v556_v49 = vld [vmem:[%s2526_s2 + $0xc8] sm:$0xff] }
  0x20   : > { %1554 = vmatprep.subr.bf16.mxu1 %v2065_v32  ;;  %v553_v48 = vld [vmem:[%s2526_s2 + $0xb0] sm:$0xff]  ;;  %398 = vmatprep.mubr.f32.mxu0 %v1923_v8  ;;  %v560_v50 = vld [vmem:[%s2526_s2 + $0xe8] sm:$0xff]  ;;  %v558_v51 = vld [vmem:[%s2526_s2 + $0xd8] sm:$0xff]  ;;  %v2128_v52 = vpack.c.bf16 %v551_v46, %v547_v44 }
  0x21   : > { %487 = vmatprep.mubr.f32.mxu1 %v1923_v8  ;;  %v562_v53 = vld [vmem:[%s2526_s2 + $0xf8] sm:$0xff]  ;;  %v2135_v54 = vpack.c.bf16 %v553_v48, %v549_v47  ;;  %v2137_v55 = vpack.c.bf16 %v560_v50, %v556_v49  ;;  %v555_v56 = vld [vmem:[%s2526_s2 + $0xc0] sm:$0xff]  ;;  %v557_v58 = vld [vmem:[%s2526_s2 + $0xd0] sm:$0xff] }
  0x22   : > { %1524 = vmatpush1.bf16.msra.mxu0 %v2078_v36  ;;  %v559_v57 = vld [vmem:[%s2526_s2 + $0xe0] sm:$0xff]  ;;  %v2149_v59 = vpack.c.bf16 %v562_v53, %v558_v51  ;;  %v561_v60 = vld [vmem:[%s2526_s2 + $0xf0] sm:$0xff]  ;;  %v564_v61 = vld [vmem:[%s2526_s2 + $0x108] sm:$0xff] }
  0x23   : > { %1556 = vmatpush1.bf16.msra.mxu1 %v2091_v40  ;;  %1526 = vmatprep.subr.bf16.mxu0 %v2093_v41  ;;  %v568_v62 = vld [vmem:[%s2526_s2 + $0x128] sm:$0xff]  ;;  %v566_v63 = vld [vmem:[%s2526_s2 + $0x118] sm:$0xff]  ;;  %v2167_v1 = vpack.c.bf16 %v559_v57, %v555_v56  ;;  %v2172_v3 = vpack.c.bf16 %v561_v60, %v557_v58  ;;  %v563_v5 = vld [vmem:[%s2526_s2 + $0x100] sm:$0xff] }
  0x24   : > { %1558 = vmatprep.subr.bf16.mxu1 %v2105_v45  ;;  %v570_v0 = vld [vmem:[%s2526_s2 + $0x138] sm:$0xff]  ;;  %v282_v2 = vld [vmem:[%s1986_s29 + $0x8] sm:$0xff]  ;;  %v2174_v4 = vpack.c.bf16 %v568_v62, %v564_v61  ;;  %v567_v6 = vld [vmem:[%s2526_s2 + $0x120] sm:$0xff] }
  0x25   : > { %v565_v7 = vld [vmem:[%s2526_s2 + $0x110] sm:$0xff]  ;;  %v2186_v9 = vpack.c.bf16 %v570_v0, %v566_v63  ;;  %1445 = vmatmul.mubr.msk.f32.gmra.mrb[2].mxu0 %vm315_vm0, %v282_v2  ;;  %v572_v11 = vld [vmem:[%s2526_s2 + $0x148] sm:$0xff]  ;;  %1449 = vmatmul.mubr.msk.f32.gmra.mrb[2].mxu1 %vm315_vm0, %v282_v2  ;;  %v574_v13 = vld [vmem:[%s2526_s2 + $0x158] sm:$0xff]  ;;  %v2208_v16 = vpack.c.bf16 %v567_v6, %v563_v5  ;;  %v295_v5 = vlaneseq }
  0x26   : > { %1528 = vmatpush1.bf16.msra.mxu0 %v2128_v52  ;;  %v569_v10 = vld [vmem:[%s2526_s2 + $0x130] sm:$0xff]  ;;  %v576_v12 = vld [vmem:[%s2526_s2 + $0x168] sm:$0xff]  ;;  %v578_v14 = vld [vmem:[%s2526_s2 + $0x178] sm:$0xff]  ;;  %404 = vmatprep.mubr.f32.mxu0 %v1923_v8 }
  0x27   : > { %1560 = vmatpush1.bf16.msra.mxu1 %v2135_v54  ;;  %1530 = vmatprep.subr.bf16.mxu0 %v2137_v55  ;;  %v283_v15 = vld [vmem:[%s1986_s29 + $0x10] sm:$0xff]  ;;  %v2213_v17 = vpack.c.bf16 %v569_v10, %v565_v7  ;;  %v2215_v20 = vpack.c.bf16 %v576_v12, %v572_v11  ;;  %v571_v21 = vld [vmem:[%s2526_s2 + $0x140] sm:$0xff]  ;;  %v2227_v25 = vpack.c.bf16 %v578_v14, %v574_v13  ;;  %v580_v28 = vld [vmem:[%s2526_s2 + $0x188] sm:$0xff]  ;;  %v296_v6 = vshrl.u32 %v295_v5, 7 }
  0x28   : > { %1562 = vmatprep.subr.bf16.mxu1 %v2149_v59  ;;  %493 = vmatprep.mubr.f32.mxu1 %v1923_v8  ;;  %v575_v22 = vld [vmem:[%s2526_s2 + $0x160] sm:$0xff]  ;;  %v573_v24 = vld [vmem:[%s2526_s2 + $0x150] sm:$0xff]  ;;  %v584_v29 = vld [vmem:[%s2526_s2 + $0x1a8] sm:$0xff] }
  0x29   : > { %v577_v26 = vld [vmem:[%s2526_s2 + $0x170] sm:$0xff]  ;;  %1446 = vmatmul.mubr.msk.f32.gmra.mrb[4].mxu0 %vm315_vm0, %v283_v15  ;;  %1450 = vmatmul.mubr.msk.f32.gmra.mrb[4].mxu1 %vm315_vm0, %v283_v15  ;;  %v582_v30 = vld [vmem:[%s2526_s2 + $0x198] sm:$0xff]  ;;  %v2249_v35 = vpack.c.bf16 %v575_v22, %v571_v21  ;;  %v2256_v38 = vpack.c.bf16 %v584_v29, %v580_v28  ;;  %v579_v39 = vld [vmem:[%s2526_s2 + $0x180] sm:$0xff]  ;;  %v297_v7 = vsub.s32 0, %v296_v6  ;;  %v301_v11 = vsub.s32 1, %v296_v6 }
  0x2a   : > { %1532 = vmatpush1.bf16.msra.mxu0 %v2167_v1  ;;  %v586_v33 = vld [vmem:[%s2526_s2 + $0x1b8] sm:$0xff]  ;;  %410 = vmatprep.mubr.f32.mxu0 %v1923_v8  ;;  %v2254_v37 = vpack.c.bf16 %v577_v26, %v573_v24  ;;  %v583_v42 = vld [vmem:[%s2526_s2 + $0x1a0] sm:$0xff]  ;;  %v581_v43 = vld [vmem:[%s2526_s2 + $0x190] sm:$0xff]  ;;  %v305_v13 = vsub.s32 2, %v296_v6  ;;  %v309_v28 = vsub.s32 3, %v296_v6 }
  0x2b   : > { %1564 = vmatpush1.bf16.msra.mxu1 %v2172_v3  ;;  %1534 = vmatprep.subr.bf16.mxu0 %v2174_v4  ;;  %v284_v34 = vld [vmem:[%s1986_s29 + $0x18] sm:$0xff]  ;;  %v2268_v44 = vpack.c.bf16 %v586_v33, %v582_v30  ;;  %v585_v46 = vld [vmem:[%s2526_s2 + $0x1b0] sm:$0xff]  ;;  %v588_v47 = vld [vmem:[%s2526_s2 + $0x1c8] sm:$0xff]  ;;  %v2289_v51 = vpack.c.bf16 %v583_v42, %v579_v39 }
  0x2c   : > { %1566 = vmatprep.subr.bf16.mxu1 %v2186_v9  ;;  %499 = vmatprep.mubr.f32.mxu1 %v1923_v8  ;;  %v592_v48 = vld [vmem:[%s2526_s2 + $0x1e8] sm:$0xff]  ;;  %v590_v49 = vld [vmem:[%s2526_s2 + $0x1d8] sm:$0xff]  ;;  %v2294_v53 = vpack.c.bf16 %v585_v46, %v581_v43  ;;  %v587_v57 = vld [vmem:[%s2526_s2 + $0x1c0] sm:$0xff] }
  0x2d   : > { %1447 = vmatmul.mubr.msk.f32.gmra.mrb[6].mxu0 %vm315_vm0, %v284_v34  ;;  %1451 = vmatmul.mubr.msk.f32.gmra.mrb[6].mxu1 %vm315_vm0, %v284_v34  ;;  %v594_v50 = vld [vmem:[%s2526_s2 + $0x1f8] sm:$0xff]  ;;  %v2296_v56 = vpack.c.bf16 %v592_v48, %v588_v47  ;;  %v591_v58 = vld [vmem:[%s2526_s2 + $0x1e0] sm:$0xff]  ;;  %v589_v61 = vld [vmem:[%s2526_s2 + $0x1d0] sm:$0xff] }
  0x2e   : > { %1536 = vmatpush1.bf16.msra.mxu0 %v2208_v16  ;;  %659 = vmatprep.mubr.f32.mxu0 %v1923_v8  ;;  %v2305_v60 = vpack.c.bf16 %v594_v50, %v590_v49  ;;  %v593_v62 = vld [vmem:[%s2526_s2 + $0x1f0] sm:$0xff]  ;;  %v2314_v63 = vpack.c.bf16 %v591_v58, %v587_v57  ;;  %v522_v2 = vld [vmem:[#allocation3] sm:$0xff]  ;;  %v523_v58 = vld [vmem:[#allocation4] sm:$0xff] }
  0x2f   : > { %1568 = vmatpush1.bf16.msra.mxu1 %v2213_v17  ;;  %1538 = vmatprep.subr.bf16.mxu0 %v2215_v20  ;;  %v2318_v0 = vpack.c.bf16 %v593_v62, %v589_v61  ;;  %v293_v10 = vld [vmem:[%s2527_s3] sm:$0xf] }
  0x30   : > { %1570 = vmatprep.subr.bf16.mxu1 %v2227_v25  ;;  %730 = vmatprep.mubr.f32.mxu1 %v1923_v8  ;;  %v2362_v12 = vrot.slane %v293_v10, %v297_v7  ;;  %v2364_v14 = vrot.slane %v293_v10, %v301_v11  ;;  %v2367_v22 = vrot.slane %v293_v10, %v305_v13 }
  0x31   : > { %v2371_v42 = vrot.slane %v293_v10, %v309_v28 }
  0x32   : > { %1540 = vmatpush1.bf16.msra.mxu0 %v2249_v35 }
  0x33   : > { %1572 = vmatpush1.bf16.msra.mxu1 %v2254_v37  ;;  %1542 = vmatprep.subr.bf16.mxu0 %v2256_v38 }
  0x34   : > { %1574 = vmatprep.subr.bf16.mxu1 %v2268_v44 }
  0x36   : > { %1544 = vmatpush1.bf16.msra.mxu0 %v2289_v51 }
  0x37   : > { %1576 = vmatpush1.bf16.msra.mxu1 %v2294_v53  ;;  %1546 = vmatprep.subr.bf16.mxu0 %v2296_v56 }
  0x38   : > { %1578 = vmatprep.subr.bf16.mxu1 %v2305_v60 }
  0x3a   : > { %1548 = vmatpush1.bf16.msra.mxu0 %v2314_v63 }
  0x3b   : > { %1580 = vmatpush1.bf16.msra.mxu1 %v2318_v0  ;;  %1582 = vmatprep.subr.bf16.mxu0 %v2027_v18 }
  0x3c   : > { %1614 = vmatprep.subr.bf16.mxu1 %v2029_v19 }
  0x3d   : > { %660 = vmatmul.mubr.f32.vlgmr.msra.gmra.mrb[0].mxu0 %v522_v2 }
  0x3e   : > { %731 = vmatmul.mubr.f32.vlgmr.msra.gmra.mrb[0].mxu1 %v522_v2  ;;  %1584 = vmatpush1.bf16.msra.mxu0 %v2038_v23 }
  0x3f   : > { %1616 = vmatpush1.bf16.msra.mxu1 %v2051_v27  ;;  %1586 = vmatprep.subr.bf16.mxu0 %v2063_v31 }
  0x40   : > { %1618 = vmatprep.subr.bf16.mxu1 %v2065_v32  ;;  %830 = vmatprep.mubr.f32.mxu0 %v1923_v8 }
  0x41   : > { %901 = vmatprep.mubr.f32.mxu1 %v1923_v8 }
  0x42   : > { %1588 = vmatpush1.bf16.msra.mxu0 %v2078_v36 }
  0x43   : > { %1620 = vmatpush1.bf16.msra.mxu1 %v2091_v40  ;;  %1590 = vmatprep.subr.bf16.mxu0 %v2093_v41 }
  0x44   : > { %1622 = vmatprep.subr.bf16.mxu1 %v2105_v45 }
  0x46   : > { %1592 = vmatpush1.bf16.msra.mxu0 %v2128_v52 }
  0x47   : > { %1624 = vmatpush1.bf16.msra.mxu1 %v2135_v54  ;;  %1594 = vmatprep.subr.bf16.mxu0 %v2137_v55 }
  0x48   : > { %1626 = vmatprep.subr.bf16.mxu1 %v2149_v59 }
  0x4a   : > { %1596 = vmatpush1.bf16.msra.mxu0 %v2167_v1 }
  0x4b   : > { %1628 = vmatpush1.bf16.msra.mxu1 %v2172_v3  ;;  %1598 = vmatprep.subr.bf16.mxu0 %v2174_v4 }
  0x4c   : > { %1630 = vmatprep.subr.bf16.mxu1 %v2186_v9 }
  0x4e   : > { %1600 = vmatpush1.bf16.msra.mxu0 %v2208_v16 }
  0x4f   : > { %1632 = vmatpush1.bf16.msra.mxu1 %v2213_v17  ;;  %1602 = vmatprep.subr.bf16.mxu0 %v2215_v20 }
  0x50   : > { %1634 = vmatprep.subr.bf16.mxu1 %v2227_v25 }
  0x52   : > { %1604 = vmatpush1.bf16.msra.mxu0 %v2249_v35 }
  0x53   : > { %1636 = vmatpush1.bf16.msra.mxu1 %v2254_v37  ;;  %1606 = vmatprep.subr.bf16.mxu0 %v2256_v38 }
  0x54   : > { %1638 = vmatprep.subr.bf16.mxu1 %v2268_v44 }
  0x56   : > { %1608 = vmatpush1.bf16.msra.mxu0 %v2289_v51 }
  0x57   : > { %1640 = vmatpush1.bf16.msra.mxu1 %v2294_v53  ;;  %1610 = vmatprep.subr.bf16.mxu0 %v2296_v56 }
  0x58   : > { %1642 = vmatprep.subr.bf16.mxu1 %v2305_v60 }
  0x5a   : > { %1612 = vmatpush1.bf16.msra.mxu0 %v2314_v63 }
  0x5b   : > { %1644 = vmatpush1.bf16.msra.mxu1 %v2318_v0  ;;  %1646 = vmatprep.subr.bf16.mxu0 %v2027_v18 }
  0x5c   : > { %1678 = vmatprep.subr.bf16.mxu1 %v2029_v19 }
 0x110   : > { %v661_v15 = vpop.f32.mrb[0].mxu0 }
 0x111   : > { %v1797_v21 = vadd.f32 %v661_v15, %v2362_v12  ;;  %v732_v24 = vpop.f32.mrb[0].mxu1  ;;  %v663_v26 = vpop.f32.mrb[1].mxu0 }
 0x112   : > { %v1798_v29 = vadd.f32 %v663_v26, %v2364_v14  ;;  %v734_v30 = vpop.f32.mrb[1].mxu1  ;;  %v1805_v39 = vadd.f32 %v732_v24, %v2367_v22 }
 0x113   : > { %v741_v33 = vmul.f32 0.5, %v1797_v21  ;;  %v1806_v43 = vadd.f32 %v734_v30, %v2371_v42 }
 0x114   : > { %v745_v34 = vmul.f32 0.5, %v1798_v29 }
 0x115   : > { %1858 = vtanh.f32 %v741_v33  ;;  %v750_v46 = vmul.f32 0.5, %v1806_v43 }
 0x116   : > { %1860 = vtanh.f32 %v745_v34 }
 0x117   : > { %1862 = vtanh.f32 %v1805_v39 }
 0x118   : > { %1864 = vtanh.f32 %v750_v46 }
 0x11f   : > { %v1859_v47 = vpop.eup %1858 }
 0x120   : > { %v1861_v48 = vpop.eup %1860  ;;  %v743_v49 = vadd.f32 1.0, %v1859_v47 }
 0x121   : > { %v747_v50 = vadd.f32 1.0, %v1861_v48  ;;  %v1863_v61 = vpop.eup %1862 }
 0x122   : > { %v744_v57 = vmul.f32 0.5, %v743_v49  ;;  %v1865_v7 = vpop.eup %1864 }
 0x123   : > { %v748_v62 = vmul.f32 0.5, %v747_v50  ;;  %v752_v10 = vadd.f32 1.0, %v1865_v7 }
 0x124   : > { %v755_v2 = vmul.f32 %v1863_v61, %v744_v57 }
 0x125   : > { %v754_v5 = vmul.f32 %v748_v62, %v523_v58  ;;  %v753_v11 = vmul.f32 0.5, %v752_v10 }
 0x127   : > { %v2374_v6 = vadd.f32 %v755_v2, %v754_v5 }
 0x129   : > { %1866 = vtanh.f32 %v2374_v6 }
 0x133   : > { %v1867_v13 = vpop.eup %1866 }
 0x134   : > { %v758_v15 = vmul.f32 %v1867_v13, %v753_v11 }
 0x136   : > { %831 = vmatmul.mubr.f32.vlgmr.msra.gmra.mrb[2].mxu0 %v758_v15  ;;  %902 = vmatmul.mubr.f32.vlgmr.msra.gmra.mrb[2].mxu1 %v758_v15 }
 0x137   : > { %1648 = vmatpush1.bf16.msra.mxu0 %v2038_v23  ;;  %1680 = vmatpush1.bf16.msra.mxu1 %v2051_v27 }
 0x138   : > { %1650 = vmatprep.subr.bf16.mxu0 %v2063_v31  ;;  %1682 = vmatprep.subr.bf16.mxu1 %v2065_v32 }
 0x139   : > { %1001 = vmatprep.mubr.f32.mxu0 %v1923_v8  ;;  %1072 = vmatprep.mubr.f32.mxu1 %v1923_v8 }
 0x13b   : > { %1652 = vmatpush1.bf16.msra.mxu0 %v2078_v36  ;;  %1684 = vmatpush1.bf16.msra.mxu1 %v2091_v40 }
 0x13c   : > { %1654 = vmatprep.subr.bf16.mxu0 %v2093_v41  ;;  %1686 = vmatprep.subr.bf16.mxu1 %v2105_v45 }
 0x13f   : > { %1656 = vmatpush1.bf16.msra.mxu0 %v2128_v52  ;;  %1688 = vmatpush1.bf16.msra.mxu1 %v2135_v54 }
 0x140   : > { %1658 = vmatprep.subr.bf16.mxu0 %v2137_v55  ;;  %1690 = vmatprep.subr.bf16.mxu1 %v2149_v59 }
 0x143   : > { %1660 = vmatpush1.bf16.msra.mxu0 %v2167_v1  ;;  %1692 = vmatpush1.bf16.msra.mxu1 %v2172_v3 }
 0x144   : > { %1662 = vmatprep.subr.bf16.mxu0 %v2174_v4  ;;  %1694 = vmatprep.subr.bf16.mxu1 %v2186_v9 }
 0x147   : > { %1664 = vmatpush1.bf16.msra.mxu0 %v2208_v16  ;;  %1696 = vmatpush1.bf16.msra.mxu1 %v2213_v17 }
 0x148   : > { %1666 = vmatprep.subr.bf16.mxu0 %v2215_v20  ;;  %1698 = vmatprep.subr.bf16.mxu1 %v2227_v25 }
 0x14b   : > { %1668 = vmatpush1.bf16.msra.mxu0 %v2249_v35  ;;  %1700 = vmatpush1.bf16.msra.mxu1 %v2254_v37 }
 0x14c   : > { %1670 = vmatprep.subr.bf16.mxu0 %v2256_v38  ;;  %1702 = vmatprep.subr.bf16.mxu1 %v2268_v44 }
 0x14f   : > { %1672 = vmatpush1.bf16.msra.mxu0 %v2289_v51  ;;  %1704 = vmatpush1.bf16.msra.mxu1 %v2294_v53 }
 0x150   : > { %1674 = vmatprep.subr.bf16.mxu0 %v2296_v56  ;;  %1706 = vmatprep.subr.bf16.mxu1 %v2305_v60 }
 0x153   : > { %1676 = vmatpush1.bf16.msra.mxu0 %v2314_v63  ;;  %1708 = vmatpush1.bf16.msra.mxu1 %v2318_v0 }
 0x154   : > { %1710 = vmatprep.subr.bf16.mxu0 %v2027_v18  ;;  %1742 = vmatprep.subr.bf16.mxu1 %v2029_v19 }
 0x209   : > { %v832_v21 = vpop.f32.mrb[2].mxu0  ;;  %v903_v24 = vpop.f32.mrb[2].mxu1 }
 0x20a   : > { %v1799_v26 = vadd.f32 %v832_v21, %v2362_v12  ;;  %v834_v28 = vpop.f32.mrb[3].mxu0  ;;  %v905_v29 = vpop.f32.mrb[3].mxu1  ;;  %v1807_v39 = vadd.f32 %v903_v24, %v2367_v22 }
 0x20b   : > { %v1800_v30 = vadd.f32 %v834_v28, %v2364_v14  ;;  %v1808_v43 = vadd.f32 %v905_v29, %v2371_v42 }
 0x20c   : > { %v912_v33 = vmul.f32 0.5, %v1799_v26 }
 0x20d   : > { %v916_v34 = vmul.f32 0.5, %v1800_v30  ;;  %v921_v18 = vmul.f32 0.5, %v1808_v43 }
 0x20e   : > { %1868 = vtanh.f32 %v912_v33 }
 0x20f   : > { %1870 = vtanh.f32 %v916_v34 }
 0x210   : > { %1872 = vtanh.f32 %v1807_v39 }
 0x211   : > { %1874 = vtanh.f32 %v921_v18 }
 0x218   : > { %v1869_v46 = vpop.eup %1868 }
 0x219   : > { %v1871_v19 = vpop.eup %1870  ;;  %v914_v47 = vadd.f32 1.0, %v1869_v46 }
 0x21a   : > { %v918_v48 = vadd.f32 1.0, %v1871_v19  ;;  %v1873_v50 = vpop.eup %1872 }
 0x21b   : > { %v915_v49 = vmul.f32 0.5, %v914_v47  ;;  %v1875_v2 = vpop.eup %1874 }
 0x21c   : > { %v919_v57 = vmul.f32 0.5, %v918_v48  ;;  %v923_v5 = vadd.f32 1.0, %v1875_v2 }
 0x21d   : > { %v926_v58 = vmul.f32 %v1873_v50, %v915_v49  ;;  %v1279_v49 = vld [vmem:[%s2528_s4 + $0x8] sm:$0xff] (!%p1452_p6)  ;;  %v1280_v50 = vld [vmem:[%s2528_s4 + $0x10] sm:$0xff] (!%p1452_p6) }
 0x21e   : > { %v925_v61 = vmul.f32 %v919_v57, %v2374_v6  ;;  %v924_v7 = vmul.f32 0.5, %v923_v5  ;;  %v1924_v57 = vmov (!%p1452_p6), 0.0|0.0   ;;  %v1282_v5 = vld [vmem:[%s2528_s4 + $0x20] sm:$0xff] (!%p1452_p6) }
 0x220   : > { %v2416_v62 = vadd.f32 %v926_v58, %v925_v61  ;;  %v1281_v61 = vld [vmem:[%s2528_s4 + $0x18] sm:$0xff] (!%p1452_p6) }
 0x221   : > { %v1777_v2 = vpack.c.bf16 (!%p1452_p6), %v1281_v61, %v1280_v50 }
 0x222   : > { %1876 = vtanh.f32 %v2416_v62 }
 0x22c   : > { %v1877_v10 = vpop.eup %1876 }
 0x22d   : > { %v929_v11 = vmul.f32 %v1877_v10, %v924_v7  ;;  %v1283_v7 = vld [vmem:[%s2528_s4 + $0x28] sm:$0xff] (!%p1452_p6) }
 0x22e   : > { %v1780_v10 = vpack.c.bf16 (!%p1452_p6), %v1283_v7, %v1282_v5 }
 0x22f   : > { %1002 = vmatmul.mubr.f32.vlgmr.msra.gmra.mrb[4].mxu0 %v929_v11  ;;  %1073 = vmatmul.mubr.f32.vlgmr.msra.gmra.mrb[4].mxu1 %v929_v11  ;;  %v1284_v11 = vld [vmem:[%s2528_s4 + $0x30] sm:$0xff] (!%p1452_p6) }
 0x230   : > { %1712 = vmatpush1.bf16.msra.mxu0 %v2038_v23  ;;  %1744 = vmatpush1.bf16.msra.mxu1 %v2051_v27 }
 0x231   : > { %1714 = vmatprep.subr.bf16.mxu0 %v2063_v31  ;;  %1746 = vmatprep.subr.bf16.mxu1 %v2065_v32 }
 0x232   : > { %1172 = vmatprep.mubr.f32.mxu0 %v1923_v8  ;;  %1243 = vmatprep.mubr.f32.mxu1 %v1923_v8 }
 0x234   : > { %1716 = vmatpush1.bf16.msra.mxu0 %v2078_v36  ;;  %1748 = vmatpush1.bf16.msra.mxu1 %v2091_v40 }
 0x235   : > { %1718 = vmatprep.subr.bf16.mxu0 %v2093_v41  ;;  %1750 = vmatprep.subr.bf16.mxu1 %v2105_v45 }
 0x238   : > { %1720 = vmatpush1.bf16.msra.mxu0 %v2128_v52  ;;  %1752 = vmatpush1.bf16.msra.mxu1 %v2135_v54 }
 0x239   : > { %1722 = vmatprep.subr.bf16.mxu0 %v2137_v55  ;;  %1754 = vmatprep.subr.bf16.mxu1 %v2149_v59 }
 0x23c   : > { %1724 = vmatpush1.bf16.msra.mxu0 %v2167_v1  ;;  %1756 = vmatpush1.bf16.msra.mxu1 %v2172_v3 }
 0x23d   : > { %1726 = vmatprep.subr.bf16.mxu0 %v2174_v4  ;;  %1758 = vmatprep.subr.bf16.mxu1 %v2186_v9 }
 0x240   : > { %1728 = vmatpush1.bf16.msra.mxu0 %v2208_v16  ;;  %1760 = vmatpush1.bf16.msra.mxu1 %v2213_v17 }
 0x241   : > { %1730 = vmatprep.subr.bf16.mxu0 %v2215_v20  ;;  %1762 = vmatprep.subr.bf16.mxu1 %v2227_v25 }
 0x244   : > { %1732 = vmatpush1.bf16.msra.mxu0 %v2249_v35  ;;  %1764 = vmatpush1.bf16.msra.mxu1 %v2254_v37 }
 0x245   : > { %1734 = vmatprep.subr.bf16.mxu0 %v2256_v38  ;;  %1766 = vmatprep.subr.bf16.mxu1 %v2268_v44 }
 0x248   : > { %1736 = vmatpush1.bf16.msra.mxu0 %v2289_v51  ;;  %1768 = vmatpush1.bf16.msra.mxu1 %v2294_v53 }
 0x249   : > { %1738 = vmatprep.subr.bf16.mxu0 %v2296_v56  ;;  %1770 = vmatprep.subr.bf16.mxu1 %v2305_v60 }
 0x24c   : > { %1740 = vmatpush1.bf16.msra.mxu0 %v2314_v63  ;;  %1772 = vmatpush1.bf16.msra.mxu1 %v2318_v0 }
 0x24d   : > { %1773 = vmatprep.subr.bf16.mxu0 (!%p1452_p6), %v1924_v57 }
 0x302   : > { %v1003_v8 = vpop.f32.mrb[4].mxu0  ;;  %v1074_v23 = vpop.f32.mrb[4].mxu1 }
 0x303   : > { %v1801_v27 = vadd.f32 %v1003_v8, %v2362_v12  ;;  %v1005_v31 = vpop.f32.mrb[5].mxu0  ;;  %v1076_v32 = vpop.f32.mrb[5].mxu1  ;;  %v1809_v45 = vadd.f32 %v1074_v23, %v2367_v22  ;;  %v1285_v8 = vld [vmem:[%s2528_s4 + $0x38] sm:$0xff] (!%p1452_p6) }
 0x304   : > { %v1802_v36 = vadd.f32 %v1005_v31, %v2364_v14  ;;  %v1810_v52 = vadd.f32 %v1076_v32, %v2371_v42  ;;  %v1783_v23 = vpack.c.bf16 (!%p1452_p6), %v1285_v8, %v1284_v11  ;;  %v1287_v31 = vld [vmem:[%s2528_s4 + $0x48] sm:$0xff] (!%p1452_p6) }
 0x305   : > { %v1083_v40 = vmul.f32 0.5, %v1801_v27  ;;  %v1286_v27 = vld [vmem:[%s2528_s4 + $0x40] sm:$0xff] (!%p1452_p6) }
 0x306   : > { %v1087_v41 = vmul.f32 0.5, %v1802_v36  ;;  %v1092_v54 = vmul.f32 0.5, %v1810_v52  ;;  %v1786_v32 = vpack.c.bf16 (!%p1452_p6), %v1287_v31, %v1286_v27  ;;  %v1288_v36 = vld [vmem:[%s2528_s4 + $0x50] sm:$0xff] (!%p1452_p6)  ;;  %v1291_v52 = vld [vmem:[%s2528_s4 + $0x68] sm:$0xff] (!%p1452_p6) }
 0x307   : > { %1878 = vtanh.f32 %v1083_v40  ;;  %v1289_v40 = vld [vmem:[%s2528_s4 + $0x58] sm:$0xff] (!%p1452_p6) }
 0x308   : > { %1880 = vtanh.f32 %v1087_v41  ;;  %v1789_v41 = vpack.c.bf16 (!%p1452_p6), %v1289_v40, %v1288_v36 }
 0x309   : > { %1882 = vtanh.f32 %v1809_v45  ;;  %v1290_v45 = vld [vmem:[%s2528_s4 + $0x60] sm:$0xff] (!%p1452_p6) }
 0x30a   : > { %1884 = vtanh.f32 %v1092_v54  ;;  %v1792_v54 = vpack.c.bf16 (!%p1452_p6), %v1291_v52, %v1290_v45 }
 0x311   : > { %v1879_v55 = vpop.eup %1878 }
 0x312   : > { %v1881_v59 = vpop.eup %1880  ;;  %v1085_v1 = vadd.f32 1.0, %v1879_v55  ;;  %v1292_v55 = vld [vmem:[%s2528_s4 + $0x70] sm:$0xff] (!%p1452_p6) }
 0x313   : > { %v1089_v3 = vadd.f32 1.0, %v1881_v59  ;;  %v1883_v9 = vpop.eup %1882  ;;  %v1293_v59 = vld [vmem:[%s2528_s4 + $0x78] sm:$0xff] (!%p1452_p6) }
 0x314   : > { %v1086_v4 = vmul.f32 0.5, %v1085_v1  ;;  %v1885_v35 = vpop.eup %1884  ;;  %v1795_v1 = vpack.c.bf16 (!%p1452_p6), %v1293_v59, %v1292_v55 }
 0x315   : > { %v1090_v16 = vmul.f32 0.5, %v1089_v3  ;;  %v1094_v37 = vadd.f32 1.0, %v1885_v35  ;;  %v1453_v3 = vld [vmem:[%s2529_s5] ss:$0 sm:$0xff] (!%p1452_p6) }
 0x316   : > { %v1097_v17 = vmul.f32 %v1883_v9, %v1086_v4 }
 0x317   : > { %v1096_v20 = vmul.f32 %v1090_v16, %v2416_v62  ;;  %v1095_v38 = vmul.f32 0.5, %v1094_v37  ;;  %v1926_v62 = vmov (!%p1452_p6), 0.0  }
 0x319   : > { %v1098_v25 = vadd.f32 %v1097_v17, %v1096_v20 }
 0x31b   : > { %1886 = vtanh.f32 %v1098_v25 }
 0x325   : > { %v1887_v44 = vpop.eup %1886 }
 0x326   : > { %v1100_v51 = vmul.f32 %v1887_v44, %v1095_v38 }
 0x328   : > { %1173 = vmatmul.mubr.f32.vlgmr.msra.gmra.mrb[6].mxu0 %v1100_v51  ;;  %1244 = vmatmul.mubr.f32.vlgmr.msra.gmra.mrb[6].mxu1 %v1100_v51 }
 0x329   : > { %1506 = vmatprep.mubr.msk.f32.mxu0 (!%p1452_p6), %vm1925_vm1, %v1926_v62 }
 0x3fb   : > { %v1174_v53 = vpop.f32.mrb[6].mxu0  ;;  %v1245_v56 = vpop.f32.mrb[6].mxu1 }
 0x3fc   : > { %v1803_v60 = vadd.f32 %v1174_v53, %v2362_v12  ;;  %v1176_v63 = vpop.f32.mrb[7].mxu0  ;;  %v1247_v0 = vpop.f32.mrb[7].mxu1  ;;  %v1811_v21 = vadd.f32 %v1245_v56, %v2367_v22 }
 0x3fd   : > { %v1804_v6 = vadd.f32 %v1176_v63, %v2364_v14  ;;  %v1812_v24 = vadd.f32 %v1247_v0, %v2371_v42  ;;  %v1278_v42 = vld [vmem:[%s2528_s4] sm:$0xff] (!%p1452_p6) }
 0x3fe   : > { %v1254_v13 = vmul.f32 0.5, %v1803_v60  ;;  %v1774_v58 = vpack.c.bf16 (!%p1452_p6), %v1279_v49, %v1278_v42 }
 0x3ff   : > { %v1258_v15 = vmul.f32 0.5, %v1804_v6  ;;  %v1263_v26 = vmul.f32 0.5, %v1812_v24 }
 0x400   : > { %1888 = vtanh.f32 %v1254_v13  ;;  %1775 = vmatpush3.bf16.msra.mxu0 (!%p1452_p6), %v1774_v58 }
 0x401   : > { %1890 = vtanh.f32 %v1258_v15  ;;  %1776 = vmatprep.subr.bf16.mxu0 (!%p1452_p6), %v1924_v57 }
 0x402   : > { %1892 = vtanh.f32 %v1811_v21 }
 0x403   : > { %1894 = vtanh.f32 %v1263_v26 }
 0x404   : > { %1778 = vmatpush3.bf16.msra.mxu0 (!%p1452_p6), %v1777_v2 }
 0x405   : > { %1779 = vmatprep.subr.bf16.mxu0 (!%p1452_p6), %v1924_v57 }
 0x408   : > { %1781 = vmatpush3.bf16.msra.mxu0 (!%p1452_p6), %v1780_v10 }
 0x409   : > { %1782 = vmatprep.subr.bf16.mxu0 (!%p1452_p6), %v1924_v57 }
 0x40a   : > { %v1889_v28 = vpop.eup %1888 }
 0x40b   : > { %v1891_v29 = vpop.eup %1890  ;;  %v1256_v30 = vadd.f32 1.0, %v1889_v28 }
 0x40c   : > { %v1260_v33 = vadd.f32 1.0, %v1891_v29  ;;  %v1893_v34 = vpop.eup %1892  ;;  %1784 = vmatpush3.bf16.msra.mxu0 (!%p1452_p6), %v1783_v23 }
 0x40d   : > { %v1257_v12 = vmul.f32 0.5, %v1256_v30  ;;  %v1895_v46 = vpop.eup %1894  ;;  %1785 = vmatprep.subr.bf16.mxu0 (!%p1452_p6), %v1924_v57 }
 0x40e   : > { %v1261_v39 = vmul.f32 0.5, %v1260_v33  ;;  %v1265_v22 = vadd.f32 1.0, %v1895_v46 }
 0x40f   : > { %v1268_v43 = vmul.f32 %v1893_v34, %v1257_v12 }
 0x410   : > { %v1267_v14 = vmul.f32 %v1261_v39, %v1098_v25  ;;  %v1266_v19 = vmul.f32 0.5, %v1265_v22  ;;  %1787 = vmatpush3.bf16.msra.mxu0 (!%p1452_p6), %v1786_v32 }
 0x411   : > { %1788 = vmatprep.subr.bf16.mxu0 (!%p1452_p6), %v1924_v57 }
 0x412   : > { %v1269_v18 = vadd.f32 %v1268_v43, %v1267_v14 }
 0x414   : > { %1896 = vtanh.f32 %v1269_v18  ;;  %1273 = vst [vmem:[#allocation4] sm:$0xff] %v1269_v18  ;;  %1790 = vmatpush3.bf16.msra.mxu0 (!%p1452_p6), %v1789_v41 }
 0x415   : > { %1791 = vmatprep.subr.bf16.mxu0 (!%p1452_p6), %v1924_v57 }
 0x418   : > { %1793 = vmatpush3.bf16.msra.mxu0 (!%p1452_p6), %v1792_v54 }
 0x419   : > { %1794 = vmatprep.subr.bf16.mxu0 (!%p1452_p6), %v1924_v57 }
 0x41b   : > { %1277 = sbr.rel (%p1452_p6) target bundleno = 1272 (0x4f8), region = 52 }
 0x41c   : > { %1796 = vmatpush3.bf16.msra.mxu0 (!%p1452_p6), %v1795_v1 }
 0x41e   : > { %v1897_v47 = vpop.eup %1896 }
 0x41f   : > { %v1271_v48 = vmul.f32 %v1897_v47, %v1266_v19 }
 0x421   : > { %1272 = vst [vmem:[#allocation3] sm:$0xff] %v1271_v48  ;;  %1507 = vmatmul.mubr.f32.vlgmr.msra.gmra.mrb[0].mxu0 (!%p1452_p6), %v1271_v48 }
 0x4f4   : > { %v1367_v4 = vpop.f32.mrb[0].mxu0 }
 0x4f5   : > { %v1368_v9 = vadd.f32 %v1453_v3, %v1367_v4  ;;  %v1508_v16 = vpop.f32.mrb[1].mxu0 }
 0x4f7   : > { %1371 = vst [vmem:[%s2530_s6] sm:$0xff] %v1368_v9 }
 0x4f8 PF: > { %s16_s23 = sadd.s32 1, %s1920_s23   ;;  %s2531_s21 = smov %s1916_s22 }
 0x4f9   : > { %p13_p7 = scmp.ge.s32.totalorder %s16_s23, 4   ;;  %s2532_s22 = smov %s2534_s24 }
 0x4fb   :  { %15 = sbr.rel (!%p13_p7) target bundleno = 2 (0x2), region = 86 }

</bundles_post_ra>
